<compile_context>
chip_gen: v7x
topology: tpu7x:2x2x1
jax: 0.10.0
libtpu: 0.0.40
codegen_flags: <defaults>
</compile_context>

<pallas_src>
import functools

import jax
import jax.numpy as jnp
from jax.experimental import pallas as pl
from jax.experimental.pallas import tpu as pltpu


def _round_up(n, m):
    return (n + m - 1) // m * m


def _epilogue_dtype_for_device():
    """bf16 epilogue on v6e/v7x (native bf16 VPU); f32 on v5e and older."""
    try:
        kind = jax.devices()[0].device_kind.lower()
    except Exception:
        return jnp.float32
    if any(tag in kind for tag in ("v2", "v3", "v4", "v5")):
        return jnp.float32
    return jnp.bfloat16


def _fused_mlp_kernel(*refs, n_layers, epilogue_dtype):
    """refs = (x_ref, w0, b0, w1, b1, ..., alphas_ref(SMEM), o_ref).

    x_ref:   [tb, Dp0]           bf16 (padded batch tile, padded features)
    w_l:     [Dp_l, Dp_{l+1}]    bf16, zero-padded, stored [in, out]
    b_l:     [1,   Dp_{l+1}]     bf16, zero-padded bias row
    alphas:  [max(n_layers-1,1)] f32 in SMEM (PReLU slope per hidden layer)
    o_ref:   [tb, Dp_last]       f32
    """
    x_ref = refs[0]
    alpha_ref = refs[1 + 2 * n_layers]
    o_ref = refs[2 + 2 * n_layers]

    h = x_ref[...]                                     # bf16, MXU-ready
    for layer in range(n_layers):
        w_ref = refs[1 + 2 * layer]
        b_ref = refs[2 + 2 * layer]
        # bf16 x bf16 -> f32 accumulate on the MXU.
        y = jnp.dot(h, w_ref[...], preferred_element_type=jnp.float32)
        if layer < n_layers - 1:
            # Hidden-layer epilogue: bf16 on v6e/v7x, f32 on v5e.
            y = y.astype(epilogue_dtype) + b_ref[...].astype(epilogue_dtype)
            a = alpha_ref[layer].astype(epilogue_dtype)
            y = jnp.where(y >= 0, y, a * y)            # PReLU
            h = y.astype(jnp.bfloat16)                 # next matmul operand
        else:
            # Final Linear: no activation; keep the f32 output precise.
            y = y + b_ref[...].astype(jnp.float32)
            o_ref[...] = y.astype(o_ref.dtype)


def init_mlp_params(key, layer_dims):
    """PyTorch-default-style init.
    Linear: U(-1/sqrt(fan_in), 1/sqrt(fan_in)) for weight and bias.
    PReLU:  single alpha = 0.25.
    Weights stored [in, out] (transposed vs. PyTorch's [out, in])."""
    params = []
    for din, dout in zip(layer_dims[:-1], layer_dims[1:]):
        key, kw, kb = jax.random.split(key, 3)
        bound = 1.0 / jnp.sqrt(jnp.float32(din))
        w = jax.random.uniform(kw, (din, dout), jnp.float32, -bound, bound)
        b = jax.random.uniform(kb, (dout,), jnp.float32, -bound, bound)
        params.append((w, b, jnp.float32(0.25)))
    return params


def prepare_mlp_for_tpu(params):
    """ONE-TIME setup (do not call per forward): zero-pad every Linear to
    lane-dense multiple-of-128 feature dims and cast to bf16.  Zero padding
    is exact: padded input columns hit zero weight rows, and padded output
    columns get zero weight cols + zero bias (PReLU(0) == 0)."""
    padded = []
    for w, b, _alpha in params:
        din, dout = w.shape
        dinp, doutp = _round_up(din, 128), _round_up(dout, 128)
        wp = jnp.zeros((dinp, doutp), jnp.float32).at[:din, :dout].set(w)
        bp = jnp.zeros((1, doutp), jnp.float32).at[0, :dout].set(b)
        padded.append((wp.astype(jnp.bfloat16), bp.astype(jnp.bfloat16)))
    n_layers = len(params)
    if n_layers > 1:
        alphas = jnp.asarray([a for (_, _, a) in params[:-1]], jnp.float32)
    else:
        alphas = jnp.zeros((1,), jnp.float32)          # dummy; never read
    out_dim = params[-1][0].shape[1]
    return padded, alphas, out_dim


def fused_mlp(x, padded_params, alphas, out_dim, *, block_b=1024,
              epilogue_dtype=None):
    """Run the whole Linear/PReLU stack in one Pallas kernel.

    x: [B, Din] (unpadded). Returns [B, out_dim] f32."""
    B, din = x.shape
    n_layers = len(padded_params)
    dinp = padded_params[0][0].shape[0]
    doutp = padded_params[-1][0].shape[1]
    if epilogue_dtype is None:
        epilogue_dtype = _epilogue_dtype_for_device()

    kernel = functools.partial(
        _fused_mlp_kernel, n_layers=n_layers, epilogue_dtype=epilogue_dtype)

    # ---- batch padding / tiling ------------------------------------------
    bp8 = _round_up(max(B, 8), 8)
    if bp8 <= block_b:
        tb, bp, n_tiles = bp8, bp8, 1
    else:
        n_tiles = pl.cdiv(bp8, block_b)
        if n_tiles % 2:                  # even grid -> both v7x TCs stay busy
            n_tiles += 1
        tb = _round_up(pl.cdiv(bp8, n_tiles), 16)      # bf16-tile friendly
        bp = n_tiles * tb

    # Cast x to bf16 (the matmul dtype); pad only when shapes require it.
    if bp == B and dinp == din:
        xp = x.astype(jnp.bfloat16)
    else:
        xp = jnp.zeros((bp, dinp), jnp.bfloat16).at[:B, :din].set(
            x.astype(jnp.bfloat16))

    flat_inputs = [xp]
    for wp, bpad in padded_params:
        flat_inputs += [wp, bpad]
    flat_inputs.append(alphas)

    out_shape = jax.ShapeDtypeStruct((bp, doutp), jnp.float32)

    if n_tiles == 1:
        # Single tile: gridless call, whole-array VMEM blocks, one DMA each.
        in_specs = [pl.BlockSpec(memory_space=pltpu.MemorySpace.VMEM)]
        for _ in padded_params:
            in_specs += [pl.BlockSpec(memory_space=pltpu.MemorySpace.VMEM),
                         pl.BlockSpec(memory_space=pltpu.MemorySpace.VMEM)]
        in_specs.append(pl.BlockSpec(memory_space=pltpu.MemorySpace.SMEM))
        out = pl.pallas_call(
            kernel,
            out_shape=out_shape,
            in_specs=in_specs,
            out_specs=pl.BlockSpec(memory_space=pltpu.MemorySpace.VMEM),
        )(*flat_inputs)
    else:
        # Large batch: grid over batch tiles only.  Weights/biases have a
        # constant index_map -> keep them resident and single-buffered;
        # "parallel" lets v7x's two TensorCores split the batch tiles.
        in_specs = [pl.BlockSpec((tb, dinp), lambda i: (i, 0))]
        weight_bytes = 0
        for wp, bpad in padded_params:
            w_in, w_out = wp.shape
            in_specs += [
                pl.BlockSpec((w_in, w_out), lambda i: (0, 0),
                             pipeline_mode=pl.Buffered(1)),
                pl.BlockSpec((1, w_out), lambda i: (0, 0),
                             pipeline_mode=pl.Buffered(1)),
            ]
            weight_bytes += (w_in * w_out + w_out) * wp.dtype.itemsize
        in_specs.append(pl.BlockSpec(memory_space=pltpu.MemorySpace.SMEM))

        # VMEM budget: resident weights (1x), double-buffered x/out streams,
        # plus f32 accumulator/intermediate scratch; generous 2x headroom.
        max_w = max(w.shape[1] for w, _ in padded_params)
        stream_bytes = 2 * tb * dinp * 2 + 2 * tb * doutp * 4
        scratch_bytes = 2 * tb * max_w * 4
        vmem_limit = int(min(
            64 << 20,
            max(32 << 20, 2 * (weight_bytes + stream_bytes + scratch_bytes))))

        out = pl.pallas_call(
            kernel,
            out_shape=out_shape,
            grid=(n_tiles,),
            in_specs=in_specs,
            out_specs=pl.BlockSpec((tb, doutp), lambda i: (i, 0)),
            compiler_params=pltpu.CompilerParams(
                dimension_semantics=("parallel",),
                vmem_limit_bytes=vmem_limit),
        )(*flat_inputs)

    return out[:B, :out_dim]


def mlp_forward(prepared, spatial_x, non_spatial_x, *, block_b=1024):
    """Mirrors MLP.forward: batch size from spatial_x, flatten non_spatial_x,
    run the Linear/PReLU stack (no activation after the final Linear).
    `prepared` is the output of prepare_mlp_for_tpu (call it once)."""
    padded_params, alphas, out_dim = prepared
    batch_size = spatial_x.shape[0]
    x = non_spatial_x.reshape(batch_size, -1)
    return fused_mlp(x, padded_params, alphas, out_dim, block_b=block_b)


def mlp_forward_ref(params, spatial_x, non_spatial_x):
    """Pure-JAX f32 reference for correctness checking."""
    batch_size = spatial_x.shape[0]
    x = non_spatial_x.reshape(batch_size, -1).astype(jnp.float32)
    n_layers = len(params)
    for idx, (w, b, alpha) in enumerate(params):
        x = x @ w + b
        if idx < n_layers - 1:
            x = jnp.where(x >= 0, x, alpha * x)
    return x


if __name__ == "__main__":
    key = jax.random.PRNGKey(0)

    # Small shapes consistent with the module's forward signature.
    layer_dims = [32, 64, 48, 8]   # in_features=32, two hidden layers, 8 outputs
    batch = 2

    k_params, k_sp, k_ns, k_sp2, k_ns2 = jax.random.split(key, 5)
    params = init_mlp_params(k_params, layer_dims)
    prepared = prepare_mlp_for_tpu(params)   # one-time padding + bf16 cast

    # spatial_x only contributes its batch dimension; non_spatial_x is flattened.
    spatial_x = jax.random.normal(k_sp, (batch, 4, 4, 4), jnp.float32)
    non_spatial_x = jax.random.normal(k_ns, (batch, layer_dims[0]), jnp.float32)

    # --- small batch: gridless (single-tile) path ---------------------------
    out = mlp_forward(prepared, spatial_x, non_spatial_x)
    jax.block_until_ready(out)
    assert out.shape == (batch, layer_dims[-1]), out.shape
    ref = mlp_forward_ref(params, spatial_x, non_spatial_x)
    assert jnp.allclose(out, ref, rtol=2e-2, atol=2e-2), (
        float(jnp.max(jnp.abs(out - ref))))

    # --- larger batch: exercises the batch-tiled (gridded) path -------------
    big_batch = 2305
    spatial_big = jax.random.normal(k_sp2, (big_batch, 4, 4, 4), jnp.float32)
    non_spatial_big = jax.random.normal(
        k_ns2, (big_batch, layer_dims[0]), jnp.float32)
    out_big = mlp_forward(prepared, spatial_big, non_spatial_big)
    jax.block_until_ready(out_big)
    assert out_big.shape == (big_batch, layer_dims[-1]), out_big.shape
    ref_big = mlp_forward_ref(params, spatial_big, non_spatial_big)
    assert jnp.allclose(out_big, ref_big, rtol=2e-2, atol=3e-2), (
        float(jnp.max(jnp.abs(out_big - ref_big))))

    print("KERNEL_OK")
</pallas_src>

<mosaic_0001>
module attributes {stable_mosaic.version = 11 : i64} {
  func.func @_fused_mlp_kernel(%arg0: memref<8x128xbf16, #tpu.memory_space<vmem>>, %arg1: memref<128x128xbf16, #tpu.memory_space<vmem>>, %arg2: memref<1x128xbf16, #tpu.memory_space<vmem>>, %arg3: memref<128x128xbf16, #tpu.memory_space<vmem>>, %arg4: memref<1x128xbf16, #tpu.memory_space<vmem>>, %arg5: memref<128x128xbf16, #tpu.memory_space<vmem>>, %arg6: memref<1x128xbf16, #tpu.memory_space<vmem>>, %arg7: memref<2xf32, #tpu.memory_space<smem>>, %arg8: memref<8x128xf32, #tpu.memory_space<vmem>>) attributes {dimension_semantics = [], scalar_prefetch = 0 : i64, scratch_operands = 0 : i64, tpu.core_type = #tpu.core_type<tc>} {
    %c0 = arith.constant 0 : index
    %c0_0 = arith.constant 0 : index
    %0 = vector.load %arg0[%c0, %c0_0] : memref<8x128xbf16, #tpu.memory_space<vmem>>, vector<8x128xbf16>
    %c0_1 = arith.constant 0 : index
    %c0_2 = arith.constant 0 : index
    %1 = vector.load %arg1[%c0_1, %c0_2] : memref<128x128xbf16, #tpu.memory_space<vmem>>, vector<128x128xbf16>
    %cst = arith.constant dense<0.000000e+00> : vector<8x128xf32>
    %2 = tpu.matmul %0, %1, %cst {dimension_numbers = #tpu.dot_dimension_numbers<[1], [0], [0], [1], [0, 0, 1, 1], [], []>} : vector<8x128xbf16>, vector<128x128xbf16>, vector<8x128xf32> -> vector<8x128xf32>
    %3 = arith.truncf %2 : vector<8x128xf32> to vector<8x128xbf16>
    %c0_3 = arith.constant 0 : index
    %c0_4 = arith.constant 0 : index
    %4 = vector.load %arg2[%c0_3, %c0_4] : memref<1x128xbf16, #tpu.memory_space<vmem>>, vector<1x128xbf16>
    %5 = vector.broadcast %4 : vector<1x128xbf16> to vector<8x128xbf16>
    %6 = arith.addf %3, %5 : vector<8x128xbf16>
    %c0_5 = arith.constant 0 : index
    %7 = memref.load %arg7[%c0_5] : memref<2xf32, #tpu.memory_space<smem>>
    %8 = arith.truncf %7 : f32 to bf16
    %cst_6 = arith.constant 0.000000e+00 : bf16
    %9 = vector.broadcast %cst_6 : bf16 to vector<8x128xbf16>
    %10 = arith.cmpf oge, %6, %9 : vector<8x128xbf16>
    %11 = vector.broadcast %8 : bf16 to vector<8x128xbf16>
    %12 = arith.mulf %11, %6 : vector<8x128xbf16>
    %13 = arith.select %10, %6, %12 : vector<8x128xi1>, vector<8x128xbf16>
    %c0_7 = arith.constant 0 : index
    %c0_8 = arith.constant 0 : index
    %14 = vector.load %arg3[%c0_7, %c0_8] : memref<128x128xbf16, #tpu.memory_space<vmem>>, vector<128x128xbf16>
    %cst_9 = arith.constant dense<0.000000e+00> : vector<8x128xf32>
    %15 = tpu.matmul %13, %14, %cst_9 {dimension_numbers = #tpu.dot_dimension_numbers<[1], [0], [0], [1], [0, 0, 1, 1], [], []>} : vector<8x128xbf16>, vector<128x128xbf16>, vector<8x128xf32> -> vector<8x128xf32>
    %16 = arith.truncf %15 : vector<8x128xf32> to vector<8x128xbf16>
    %c0_10 = arith.constant 0 : index
    %c0_11 = arith.constant 0 : index
    %17 = vector.load %arg4[%c0_10, %c0_11] : memref<1x128xbf16, #tpu.memory_space<vmem>>, vector<1x128xbf16>
    %18 = vector.broadcast %17 : vector<1x128xbf16> to vector<8x128xbf16>
    %19 = arith.addf %16, %18 : vector<8x128xbf16>
    %c1 = arith.constant 1 : index
    %20 = memref.load %arg7[%c1] : memref<2xf32, #tpu.memory_space<smem>>
    %21 = arith.truncf %20 : f32 to bf16
    %cst_12 = arith.constant 0.000000e+00 : bf16
    %22 = vector.broadcast %cst_12 : bf16 to vector<8x128xbf16>
    %23 = arith.cmpf oge, %19, %22 : vector<8x128xbf16>
    %24 = vector.broadcast %21 : bf16 to vector<8x128xbf16>
    %25 = arith.mulf %24, %19 : vector<8x128xbf16>
    %26 = arith.select %23, %19, %25 : vector<8x128xi1>, vector<8x128xbf16>
    %c0_13 = arith.constant 0 : index
    %c0_14 = arith.constant 0 : index
    %27 = vector.load %arg5[%c0_13, %c0_14] : memref<128x128xbf16, #tpu.memory_space<vmem>>, vector<128x128xbf16>
    %cst_15 = arith.constant dense<0.000000e+00> : vector<8x128xf32>
    %28 = tpu.matmul %26, %27, %cst_15 {dimension_numbers = #tpu.dot_dimension_numbers<[1], [0], [0], [1], [0, 0, 1, 1], [], []>} : vector<8x128xbf16>, vector<128x128xbf16>, vector<8x128xf32> -> vector<8x128xf32>
    %c0_16 = arith.constant 0 : index
    %c0_17 = arith.constant 0 : index
    %29 = vector.load %arg6[%c0_16, %c0_17] : memref<1x128xbf16, #tpu.memory_space<vmem>>, vector<1x128xbf16>
    %30 = arith.extf %29 : vector<1x128xbf16> to vector<1x128xf32>
    %31 = vector.broadcast %30 : vector<1x128xf32> to vector<8x128xf32>
    %32 = arith.addf %28, %31 : vector<8x128xf32>
    %c0_18 = arith.constant 0 : index
    %c0_19 = arith.constant 0 : index
    %33 = vector.load %arg8[%c0_18, %c0_19] : memref<8x128xf32, #tpu.memory_space<vmem>>, vector<8x128xf32>
    tpu.vector_store %arg8[%c0_18, %c0_19], %32 {strides = array<i32>} : memref<8x128xf32, #tpu.memory_space<vmem>>, vector<8x128xf32>,
    return
  }
}

</mosaic_0001>

<bundles_post_ra>
// kernel: tpu_custom_call.1
= control target key start
LH: loop header
LB: loop body
LE: loop exit
PB: predicated region body
PF: predicated region fallthrough
CT: control target
= control target key end

     0   :  { %13 = vsyncpa [#allocation3], 0  ;;  %s935_s0 = inlined_call_operand.hbm [shape: bf16[8,128], index: 0, kind: input, shape index: {}]   ;;  %s936_s1 = inlined_call_operand.hbm [shape: bf16[128,128], index: 1, kind: input, shape index: {}]   ;;  %s937_s2 = inlined_call_operand.vmem [shape: bf16[1,128], index: 2, kind: input, shape index: {}]   ;;  %s938_s3 = inlined_call_operand.hbm [shape: bf16[128,128], index: 3, kind: input, shape index: {}]   ;;  %s939_s4 = inlined_call_operand.vmem [shape: bf16[1,128], index: 4, kind: input, shape index: {}]   ;;  %s940_s5 = inlined_call_operand.hbm [shape: bf16[128,128], index: 5, kind: input, shape index: {}]   ;;  %s941_s6 = inlined_call_operand.vmem [shape: bf16[1,128], index: 6, kind: input, shape index: {}]   ;;  %s942_s7 = inlined_call_operand.vmem [shape: f32[2], index: 7, kind: input, shape index: {}]   ;;  %s943_s8 = inlined_call_operand.hbm [shape: f32[8,128], index: 8, kind: output, shape index: {}]  }
   0x1   :  { %14 = vsyncpa [#allocation7], 0 }
   0x2   :  { %15 = vsyncpa [#allocation10], 0 }
   0x3   :  { %16 = vsyncpa [#allocation5], 0 }
   0x4   :  { %17 = vsyncpa [#allocation4], 0  ;;  %s769_s27 = smov [#allocation6]   ;;  %s637_s9 = scalar_lea.hbm %s936_s1, 1024 }
   0x5   :  { %s33_s28 = sshll.u32 %s769_s27, 4  ;;  %p638_p0 = scmp.ne.s32.totalorder %s936_s1, %s637_s9  ;;  %s34_s28 = int_to_ptr.vmem [resolvable:$true] %s33_s28 }
   0x6   :  { %p641_p1 = scmp.lt.u32.totalorder %s637_s9, %s936_s1 }
   0x8   :  { %p643_p2 = pnand %p641_p1, %p638_p0 }
   0xa   :  { %646 = shalt.err (!%p643_p2)
}
   0xb   :  { %s647_s14 = scalar_lea.vmem %s34_s28, 1024  ;;  %p652_p4 = scmp.lt.s32.totalorder %s34_s28, %s34_s28 }
   0xc   :  { %p648_p3 = scmp.ne.s32.totalorder %s34_s28, %s647_s14  ;;  %p653_p5 = scmp.lt.s32.totalorder %s647_s14, %s647_s14 }
   0xe   :  { %p654_p6 = por %p653_p5, %p652_p4 }
  0x10   :  { %p655_p7 = pnand %p654_p6, %p648_p3 }
  0x12   :  { %658 = shalt.err (!%p655_p7)
}
  0x13   :  { %s770_s15 = smov 64   ;;  %s771_s16 = smov 4  }
  0x14   :  { %39 = dma.hbm_to_vmem [thread:$0]  %s936_s1, 1024, %s34_s28, [#allocation7], %s770_s15, %s770_s15, %s771_s16  }
  0x15   :  { %s772_s19 = smov [#allocation2]   ;;  %s773_s21 = smov [#allocation8]  }
  0x16   :  { %s24_s20 = sshll.u32 %s772_s19, 4  ;;  %s47_s22 = sshll.u32 %s773_s21, 4  ;;  %s25_s20 = int_to_ptr.vmem [resolvable:$true] %s24_s20  ;;  %s48_s22 = int_to_ptr.vmem [resolvable:$true] %s47_s22 }
  0x17   :  { %s659_s25 = scalar_lea.hbm %s935_s0, 64 }
  0x18   :  { %p660_p8 = scmp.ne.s32.totalorder %s935_s0, %s659_s25  ;;  %p663_p9 = scmp.lt.u32.totalorder %s659_s25, %s935_s0 }
  0x1a   :  { %p665_p10 = pnand %p663_p9, %p660_p8 }
  0x1c   :  { %668 = shalt.err (!%p665_p10)
}
  0x1d   :  { %s669_s1 = scalar_lea.vmem %s25_s20, 64  ;;  %p674_p12 = scmp.lt.s32.totalorder %s25_s20, %s25_s20 }
  0x1e   :  { %p670_p11 = scmp.ne.s32.totalorder %s25_s20, %s669_s1  ;;  %p675_p13 = scmp.lt.s32.totalorder %s669_s1, %s669_s1 }
  0x20   :  { %p676_p0 = por %p675_p13, %p674_p12 }
  0x22   :  { %p677_p1 = pnand %p676_p0, %p670_p11 }
  0x24   :  { %680 = shalt.err (!%p677_p1)
}
  0x25   :  { %27 = dma.hbm_to_vmem [thread:$0]  %s935_s0, 64, %s25_s20, [#allocation3]  }
  0x26   :  { %s681_s12 = scalar_lea.hbm %s938_s3, 1024 }
  0x27   :  { %p682_p2 = scmp.ne.s32.totalorder %s938_s3, %s681_s12  ;;  %p685_p3 = scmp.lt.u32.totalorder %s681_s12, %s938_s3 }
  0x29   :  { %p687_p4 = pnand %p685_p3, %p682_p2 }
  0x2b   :  { %690 = shalt.err (!%p687_p4)
}
  0x2c   :  { %s691_s19 = scalar_lea.vmem %s48_s22, 1024  ;;  %p696_p6 = scmp.lt.s32.totalorder %s48_s22, %s48_s22 }
  0x2d   :  { %p692_p5 = scmp.ne.s32.totalorder %s48_s22, %s691_s19  ;;  %p697_p7 = scmp.lt.s32.totalorder %s691_s19, %s691_s19 }
  0x2f   :  { %p698_p8 = por %p697_p7, %p696_p6 }
  0x31   :  { %p699_p9 = pnand %p698_p8, %p692_p5 }
  0x33   :  { %702 = shalt.err (!%p699_p9)
}
  0x34   :  { %53 = dma.hbm_to_vmem [thread:$0]  %s938_s3, 1024, %s48_s22, [#allocation7], %s770_s15, %s770_s15, %s771_s16  }
  0x35   :  { %s774_s21 = smov [#allocation9]   ;;  %s76_s26 = sshll.u32 %s942_s7, 4  ;;  %s77_s26 = int_to_ptr.vmem [resolvable:$true] %s76_s26 }
  0x36   :  { %s61_s23 = sshll.u32 %s774_s21, 4  ;;  %s703_s30 = scalar_lea.hbm %s940_s5, 1024  ;;  %s62_s23 = int_to_ptr.vmem [resolvable:$true] %s61_s23 }
  0x37   :  { %p704_p10 = scmp.ne.s32.totalorder %s940_s5, %s703_s30  ;;  %p707_p11 = scmp.lt.u32.totalorder %s703_s30, %s940_s5 }
  0x39   :  { %p709_p12 = pnand %p707_p11, %p704_p10 }
  0x3b   :  { %712 = shalt.err (!%p709_p12)
}
  0x3c   :  { %s713_s3 = scalar_lea.vmem %s62_s23, 1024  ;;  %p718_p0 = scmp.lt.s32.totalorder %s62_s23, %s62_s23 }
  0x3d   :  { %p714_p13 = scmp.ne.s32.totalorder %s62_s23, %s713_s3  ;;  %p719_p1 = scmp.lt.s32.totalorder %s713_s3, %s713_s3 }
  0x3f   :  { %p720_p2 = por %p719_p1, %p718_p0 }
  0x41   :  { %p721_p3 = pnand %p720_p2, %p714_p13 }
  0x43   :  { %724 = shalt.err (!%p721_p3)
}
  0x44   :  { %67 = dma.hbm_to_vmem [thread:$0]  %s940_s5, 1024, %s62_s23, [#allocation10], %s770_s15, %s770_s15, %s771_s16  }
  0x45   :  { %s725_s11 = scalar_lea.vmem %s77_s26, 16  ;;  %p730_p5 = scmp.lt.s32.totalorder %s77_s26, %s77_s26 }
  0x46   :  { %p726_p4 = scmp.ne.s32.totalorder %s77_s26, %s725_s11  ;;  %p731_p6 = scmp.lt.s32.totalorder %s725_s11, %s725_s11 }
  0x48   :  { %p732_p7 = por %p731_p6, %p730_p5 }
  0x4a   :  { %p733_p8 = pnand %p732_p7, %p726_p4 }
  0x4c   :  { %736 = shalt.err (!%p733_p8)
}
  0x4d   :  { %s775_s12 = smov [#allocation11]  }
  0x4e   :  { %79 = dma.vmem_to_smem %s77_s26, 16, %s775_s12, [#allocation5]  }
  0x4f   :  { %759 = dma.done.wait [#allocation3], 64  }
  0x50   :  { %760 = vsyncadd [#allocation3], 4294967232 }
  0x51   :  { %761 = dma.done.wait [#allocation7], 2048  }
  0x52   :  { %762 = vsyncadd [#allocation7], 4294965248 }
  0x53   :  { %763 = dma.done.wait [#allocation10], 1024  }
  0x54   :  { %764 = vsyncadd [#allocation10], 4294966272 }
  0x55   :  { %765 = dma.done.wait [#allocation5], 16  }
  0x56   :  { %766 = vsyncadd [#allocation5], 4294967280 }
  0x57   :  { %95 = sfence }
  0x58   :  { %v613_v0 = vld [vmem:[#allocation6] sm:$0xff]   ;;  %v776_v1 = vmov 0.0   ;;  %v614_v2 = vld [vmem:[#allocation6 + $0x8] sm:$0xff]   ;;  %vm777_vm0 = vmmov 0   ;;  %v615_v3 = vld [vmem:[#allocation6 + $0x10] sm:$0xff]   ;;  %s212_s5 = sld [smem:[#allocation11]]  ;;  %v207_v24 = vlaneseq }
  0x59   :  { %543 = vmatprep.subr.bf16.mxu0 %v776_v1  ;;  %563 = vmatprep.subr.bf16.mxu1 %v776_v1  ;;  %v621_v4 = vld [vmem:[#allocation8] sm:$0xff]   ;;  %v616_v5 = vld [vmem:[#allocation6 + $0x18] sm:$0xff]   ;;  %v622_v6 = vld [vmem:[#allocation8 + $0x8] sm:$0xff]  }
  0x5a   :  { %544 = vmatpush3.bf16.msra.mxu0 %v613_v0  ;;  %559 = vmatprep.mubr.msk.bf16.mxu0 %vm777_vm0, %v776_v1  ;;  %v617_v7 = vld [vmem:[#allocation6 + $0x20] sm:$0xff]   ;;  %v623_v8 = vld [vmem:[#allocation8 + $0x10] sm:$0xff]   ;;  %v618_v9 = vld [vmem:[#allocation6 + $0x28] sm:$0xff]   ;;  %v208_v25 = vshrl.u32 %v207_v24, 7 }
  0x5b   :  { %545 = vmatprep.subr.bf16.mxu0 %v776_v1  ;;  %579 = vmatprep.mubr.msk.bf16.mxu1 %vm777_vm0, %v776_v1  ;;  %v624_v10 = vld [vmem:[#allocation8 + $0x18] sm:$0xff]   ;;  %v619_v11 = vld [vmem:[#allocation6 + $0x30] sm:$0xff]   ;;  %v625_v12 = vld [vmem:[#allocation8 + $0x20] sm:$0xff]  }
  0x5c   :  { %564 = vmatpush3.bf16.msra.mxu1 %v621_v4  ;;  %v620_v13 = vld [vmem:[#allocation6 + $0x38] sm:$0xff]   ;;  %v626_v14 = vld [vmem:[#allocation8 + $0x28] sm:$0xff]   ;;  %v627_v16 = vld [vmem:[#allocation8 + $0x30] sm:$0xff]   ;;  %v209_v28 = vsub.s32 0, %v208_v25 }
  0x5d   :  { %565 = vmatprep.subr.bf16.mxu1 %v776_v1  ;;  %v97_v15 = vld [vmem:[#allocation2] sm:$0xf]  ;;  %v629_v18 = vld [vmem:[#allocation9] sm:$0xff]   ;;  %v630_v19 = vld [vmem:[#allocation9 + $0x8] sm:$0xff]  }
  0x5e   :  { %546 = vmatpush3.bf16.msra.mxu0 %v614_v2  ;;  %v628_v17 = vld [vmem:[#allocation8 + $0x38] sm:$0xff]   ;;  %v631_v20 = vld [vmem:[#allocation9 + $0x10] sm:$0xff]   ;;  %v633_v22 = vld [vmem:[#allocation9 + $0x20] sm:$0xff]   ;;  %s215_s15 = sshrl.u32 %s212_s5, 16  ;;  %p214_p9 = scmp.ne.f32.partialorder %s212_s5, %s212_s5 }
  0x5f   :  { %547 = vmatprep.subr.bf16.mxu0 %v776_v1  ;;  %v632_v21 = vld [vmem:[#allocation9 + $0x18] sm:$0xff]   ;;  %v634_v23 = vld [vmem:[#allocation9 + $0x28] sm:$0xff]   ;;  %s216_s16 = sand.u32 1, %s215_s15  ;;  %v635_v39 = vld [vmem:[#allocation9 + $0x30] sm:$0xff]  }
  0x60   :  { %566 = vmatpush3.bf16.msra.mxu1 %v622_v6  ;;  %s217_s13 = sadd.s32 32767, %s216_s16  ;;  %v203_v26 = vld [vmem:[%s937_s2] sm:$0x1]  ;;  %s507_s2 = sld [smem:[#allocation11 + $0x1]] }
  0x61   :  { %567 = vmatprep.subr.bf16.mxu1 %v776_v1  ;;  %s218_s14 = sadd.s32 %s217_s13, %s212_s5  ;;  %v205_v27 = vpack.i.b16 %v203_v26, %v203_v26  ;;  %v636_v40 = vld [vmem:[#allocation9 + $0x38] sm:$0xff]  }
  0x62   :  { %548 = vmatpush3.bf16.msra.mxu0 %v615_v3  ;;  %s219_s17 = sand.u32 4294901760, %s218_s14  ;;  %v335_v41 = vld [vmem:[%s939_s4] sm:$0x1]  ;;  %s778_s4 = smov [#allocation12]  }
  0x63   :  { %549 = vmatprep.subr.bf16.mxu0 %v776_v1  ;;  %s945_s17 = smov (%p214_p9, %s219_s17), 2143289344  ;;  %v210_v29 = vrot.slane %v205_v27, %v209_v28  ;;  %v337_v42 = vpack.i.b16 %v335_v41, %v335_v41  ;;  %v378_v53 = vld [vmem:[%s941_s6] sm:$0x1]  ;;  %s479_s7 = sshll.u32 %s778_s4, 4  ;;  %s480_s7 = int_to_ptr.vmem [resolvable:$true] %s479_s7 }
  0x64   :  { %568 = vmatpush3.bf16.msra.mxu1 %v623_v8  ;;  %s222_s0 = sshrl.u32 %s945_s17, 16  ;;  %v379_v54 = vunpack.c.l.bf16 %v378_v53  ;;  %s737_s22 = scalar_lea.vmem %s480_s7, 128 }
  0x65   :  { %569 = vmatprep.subr.bf16.mxu1 %v776_v1  ;;  %s224_s20 = sshll.u32 %s222_s0, 16  ;;  %v342_v43 = vrot.slane %v337_v42, %v209_v28  ;;  %p738_p11 = scmp.ne.s32.totalorder %s480_s7, %s737_s22 }
  0x66   :  { %550 = vmatpush3.bf16.msra.mxu0 %v616_v5  ;;  %s225_s21 = sor.u32 %s224_s20, %s222_s0  ;;  %s347_s23 = sshrl.u32 %s507_s2, 16  ;;  %v383_v55 = vrot.slane %v379_v54, %v209_v28 }
  0x67   :  { %551 = vmatprep.subr.bf16.mxu0 %v776_v1  ;;  %v226_v34 = vstv %s225_s21  ;;  %s348_s24 = sand.u32 1, %s347_s23  ;;  %p346_p10 = scmp.ne.f32.partialorder %s507_s2, %s507_s2 }
  0x68   :  { %570 = vmatpush3.bf16.msra.mxu1 %v624_v10  ;;  %s349_s25 = sadd.s32 32767, %s348_s24  ;;  %p742_p12 = scmp.lt.s32.totalorder %s480_s7, %s480_s7 }
  0x69   :  { %571 = vmatprep.subr.bf16.mxu1 %v776_v1  ;;  %s350_s26 = sadd.s32 %s507_s2, %s349_s25  ;;  %p743_p13 = scmp.lt.s32.totalorder %s737_s22, %s737_s22 }
  0x6a   :  { %552 = vmatpush3.bf16.msra.mxu0 %v617_v7  ;;  %s351_s27 = sand.u32 4294901760, %s350_s26 }
  0x6b   :  { %553 = vmatprep.subr.bf16.mxu0 %v776_v1  ;;  %s947_s27 = smov (%p346_p10, %s351_s27), 2143289344  ;;  %p744_p0 = por %p743_p13, %p742_p12 }
  0x6c   :  { %572 = vmatpush3.bf16.msra.mxu1 %v625_v12  ;;  %s354_s1 = sshrl.u32 %s947_s27, 16 }
  0x6d   :  { %573 = vmatprep.subr.bf16.mxu1 %v776_v1  ;;  %s356_s28 = sshll.u32 %s354_s1, 16  ;;  %p745_p1 = pnand %p744_p0, %p738_p11 }
  0x6e   :  { %554 = vmatpush3.bf16.msra.mxu0 %v618_v9  ;;  %s357_s9 = sor.u32 %s356_s28, %s354_s1 }
  0x6f   :  { %555 = vmatprep.subr.bf16.mxu0 %v776_v1  ;;  %v358_v47 = vstv %s357_s9 }
  0x70   :  { %574 = vmatpush3.bf16.msra.mxu1 %v626_v14 }
  0x71   :  { %575 = vmatprep.subr.bf16.mxu1 %v776_v1 }
  0x72   :  { %556 = vmatpush3.bf16.msra.mxu0 %v619_v11 }
  0x73   :  { %557 = vmatprep.subr.bf16.mxu0 %v776_v1 }
  0x74   :  { %576 = vmatpush3.bf16.msra.mxu1 %v627_v16 }
  0x75   :  { %577 = vmatprep.subr.bf16.mxu1 %v776_v1 }
  0x76   :  { %558 = vmatpush3.bf16.msra.mxu0 %v620_v13 }
  0x77   :  { %583 = vmatprep.subr.bf16.mxu0 %v776_v1 }
  0x78   :  { %578 = vmatpush3.bf16.msra.mxu1 %v628_v17 }
  0x79   :  { %560 = vmatmul.mubr.bf16.vlgmr.msra.gmra.mrb[0].mxu0 %v97_v15 }
  0x7a   :  { %599 = vmatprep.mubr.msk.bf16.mxu0 %vm777_vm0, %v776_v1  ;;  %584 = vmatpush3.bf16.msra.mxu0 %v629_v18 }
  0x7b   :  { %585 = vmatprep.subr.bf16.mxu0 %v776_v1 }
  0x7e   :  { %586 = vmatpush3.bf16.msra.mxu0 %v630_v19 }
  0x7f   :  { %587 = vmatprep.subr.bf16.mxu0 %v776_v1 }
  0x82   :  { %588 = vmatpush3.bf16.msra.mxu0 %v631_v20 }
  0x83   :  { %589 = vmatprep.subr.bf16.mxu0 %v776_v1 }
  0x86   :  { %590 = vmatpush3.bf16.msra.mxu0 %v632_v21 }
  0x87   :  { %591 = vmatprep.subr.bf16.mxu0 %v776_v1 }
  0x8a   :  { %592 = vmatpush3.bf16.msra.mxu0 %v633_v22 }
  0x8b   :  { %593 = vmatprep.subr.bf16.mxu0 %v776_v1 }
  0x8e   :  { %594 = vmatpush3.bf16.msra.mxu0 %v634_v23 }
  0x8f   :  { %595 = vmatprep.subr.bf16.mxu0 %v776_v1 }
  0x92   :  { %596 = vmatpush3.bf16.msra.mxu0 %v635_v39 }
  0x93   :  { %597 = vmatprep.subr.bf16.mxu0 %v776_v1 }
  0x96   :  { %598 = vmatpush3.bf16.msra.mxu0 %v636_v40 }
 0x14c   :  { %v196_v30 = vpop.f32.mrb[0].mxu0 }
 0x14d   :  { %v202_v31 = vpack.c.bf16 %v196_v30, %v196_v30  ;;  %v561_v32 = vpop.f32.mrb[1].mxu0 }
 0x14e   :  { %v199_v33 = vpop.f32.mrb[2].mxu0 }
 0x14f   :  { %v211_v35 = vadd.bf16 %v210_v29, %v202_v31  ;;  %v562_v36 = vpop.f32.mrb[3].mxu0 }
 0x151   :  { %vm223_vm1 = vcmp.ge.bf16.partialorder %v211_v35, 0  ;;  %v228_v37 = vmul.bf16 %v226_v34, %v211_v35 }
 0x153   :  { %v229_v38 = vsel %vm223_vm1, %v211_v35, %v228_v37 }
 0x154   :  { %580 = vmatmul.mubr.bf16.vlgmr.msra.gmra.mrb[0].mxu1 %v229_v38 }
 0x227   :  { %v328_v44 = vpop.f32.mrb[0].mxu1 }
 0x228   :  { %v334_v45 = vpack.c.bf16 %v328_v44, %v328_v44  ;;  %v581_v46 = vpop.f32.mrb[1].mxu1 }
 0x229   :  { %v331_v48 = vpop.f32.mrb[2].mxu1 }
 0x22a   :  { %v343_v49 = vadd.bf16 %v342_v43, %v334_v45  ;;  %v582_v50 = vpop.f32.mrb[3].mxu1 }
 0x22c   :  { %v360_v51 = vmul.bf16 %v358_v47, %v343_v49  ;;  %vm355_vm2 = vcmp.ge.bf16.partialorder %v343_v49, 0 }
 0x22e   :  { %v361_v52 = vsel %vm355_vm2, %v343_v49, %v360_v51 }
 0x22f   :  { %600 = vmatmul.mubr.bf16.vlgmr.msra.gmra.mrb[4].mxu0 %v361_v52 }
 0x302   :  { %v466_v56 = vpop.f32.mrb[4].mxu0 }
 0x303   :  { %v467_v57 = vadd.f32 %v466_v56, %v383_v55  ;;  %v601_v58 = vpop.f32.mrb[5].mxu0 }
 0x304   :  { %v469_v59 = vpop.f32.mrb[6].mxu0 }
 0x305   :  { %472 = vst [vmem:[#allocation12] sm:$0xff] %v467_v57  ;;  %v602_v60 = vpop.f32.mrb[7].mxu0 }
 0x306   :  { %748 = shalt.err (!%p745_p1)
}
 0x307   :  { %s749_s12 = scalar_lea.hbm %s943_s8, 128 }
 0x308   :  { %p750_p2 = scmp.ne.s32.totalorder %s943_s8, %s749_s12  ;;  %p753_p3 = scmp.lt.u32.totalorder %s749_s12, %s943_s8 }
 0x30a   :  { %p755_p4 = pnand %p753_p3, %p750_p2 }
 0x30c   :  { %758 = shalt.err (!%p755_p4)
}
 0x30d   :  { %482 = dma.vmem_to_hbm [thread:$0]  %s480_s7, 128, %s943_s8, [#allocation4]  }
 0x30e   :  { %767 = dma.done.wait [#allocation4], 128  }
 0x30f   :  { %768 = vsyncadd [#allocation4], 4294967168 }
 0x310   :  { %486 = vsyncpa [#allocation3], 1 }
 0x311   :  { %487 = vsyncpa [#allocation7], 1 }
 0x312   :  { %488 = vsyncpa [#allocation10], 1 }
 0x313   :  { %489 = vsyncpa [#allocation4], 1 }
 0x314   :  { %490 = vsyncpa [#allocation5], 1 }

</bundles_post_ra>
